<compile_context>
chip_gen: v7x
topology: tpu7x:2x2x1
jax: 0.10.0
libtpu: 0.0.40
codegen_flags: <defaults>
</compile_context>

<pallas_src>
import functools

import jax
import jax.numpy as jnp
from jax.experimental import pallas as pl
from jax.experimental.pallas import tpu as pltpu

_LANE = 128       # lane width: last block dim must be a multiple of this (or the full dim)
_F32_BYTES = 4


def _round_up(v, m):
    return ((v + m - 1) // m) * m


def _vmem_capacity_bytes():
    """Physical VMEM of the local device; conservative fallback if the query is unavailable."""
    try:
        return int(pltpu.get_tpu_info().vmem_capacity_bytes)
    except Exception:  # pragma: no cover - older jax / non-TPU tracing environments
        return 64 * 1024 * 1024  # v7x-sized (smallest generation) fallback


def _vmem_step_estimate(C, lt, weight_bufs):
    """Rough per-step VMEM footprint (f32): resident weights + pipelined tiles + kernel temps."""
    weights = weight_bufs * (3 * C * C + C) * _F32_BYTES
    tiles = 2 * (3 * C * lt + C * _LANE) * _F32_BYTES   # xe / xo / out double-buffered + halo
    temps = 3 * C * lt * _F32_BYTES                     # rolled tap + accumulator headroom
    return weights + tiles + temps


def _downsample1d_kernel(w0_ref, w1_ref, w2_ref, b_ref, xe_ref, xeh_ref, xo_ref, o_ref):
    # w{0,1,2}_ref: (C, C)    conv taps k = 0, 1, 2 (resident across the whole grid)
    # b_ref:        (C, 1)    bias (resident)
    # xe_ref:       (C, lt)   even plane tile:  xe[:, j] = x_pad[:, 2*(t*lt + j)]
    # xeh_ref:      (C, 128)  halo: column 0 is xe[:, (t+1)*lt] (value irrelevant on ragged tiles)
    # xo_ref:       (C, lt)   odd plane tile:   xo[:, j] = x_pad[:, 2*(t*lt + j) + 1]
    # o_ref:        (C, lt)   output tile (lane-dense; OOB lanes of a ragged tile are dropped)
    xe = xe_ref[...]
    lt = xe.shape[-1]

    # x_pad[:, 2g+2] == xe[:, j+1]; the roll (XLU, jnp.roll convention) supplies it for
    # j < lt-1, keeping everything lane-aligned without an iota/where over the full tile.
    xe_next = pltpu.roll(xe, shift=lt - 1, axis=1)      # xe_next[:, j] == xe[:, (j + 1) % lt]

    acc = jnp.dot(w0_ref[...], xe, preferred_element_type=jnp.float32)
    acc = acc + jnp.dot(w1_ref[...], xo_ref[...], preferred_element_type=jnp.float32)
    acc = acc + jnp.dot(w2_ref[...], xe_next, preferred_element_type=jnp.float32)
    o_ref[...] = (acc + b_ref[...]).astype(o_ref.dtype)

    # The tile's last column used the wrapped xe[:, 0] for its W2 tap; swap in the halo column
    # via a single (C, 1) correction matvec + masked 1-lane store (no full-tile select).
    corr = jnp.dot(w2_ref[...], xeh_ref[:, 0:1] - xe[:, 0:1],
                   preferred_element_type=jnp.float32)
    o_ref[:, lt - 1:lt] = (o_ref[:, lt - 1:lt].astype(jnp.float32) + corr).astype(o_ref.dtype)


def _reference_conv(x, weight, bias):
    y = jax.lax.conv_general_dilated(
        x, weight, window_strides=(2,), padding=[(1, 1)],
        dimension_numbers=("NCH", "OIH", "NCH"),
        precision=jax.lax.Precision.HIGHEST)
    return y + bias[None, :, None]


@functools.partial(jax.jit, static_argnames=("block_l",))
def _downsample1d_pallas(x, weight, bias, *, block_l):
    N, C, L = x.shape
    L_out = (L - 1) // 2 + 1

    # ---- generation/VMEM-aware tile selection --------------------------------------------
    vmem_limit = min(int(_vmem_capacity_bytes() * 0.6), 64 * 1024 * 1024)
    if block_l is None:
        # Larger tiles on 128-MiB-VMEM parts (v5e/v6e), 512 elsewhere (v7x has 64 MiB).
        block_l = 1024 if vmem_limit >= 56 * 1024 * 1024 else 512
    single_buffer_w = C >= 256 and hasattr(pl, "Buffered")   # weight double-buffer only matters at large C
    w_bufs = 1 if single_buffer_w else 2
    lt = max(_LANE, min(_round_up(block_l, _LANE), _round_up(L_out, _LANE)))
    while lt > _LANE and _vmem_step_estimate(C, lt, w_bufs) > int(vmem_limit * 0.7):
        lt -= _LANE
    # TODO(synk): for very large C (>= ~1024 on v7x) add a cout grid axis so each step holds
    # (tile_cout, C) weight slices instead of three full resident (C, C) taps.
    num_l_tiles = pl.cdiv(L_out, lt)

    # ---- stride-2 phase split (the only wrapper glue; fused under this jit) --------------
    #   xe[:, :, l] = x_pad[:, :, 2l]   = x[:, :, 2l-1]  (zero at l = 0 and, for odd L, l = L_out)
    #   xo[:, :, l] = x_pad[:, :, 2l+1] = x[:, :, 2l]
    n_odd = L // 2
    xe = jnp.pad(x[:, :, 1::2], ((0, 0), (0, 0), (1, L_out - n_odd)))   # (N, C, L_out + 1)
    xo = x[:, :, 0::2]                                                  # (N, C, L_out)

    w0 = weight[:, :, 0]
    w1 = weight[:, :, 1]
    w2 = weight[:, :, 2]
    b_col = bias.reshape(C, 1)

    def _resident(shape):
        idx = lambda n, t: (0, 0)
        if single_buffer_w:
            return pl.BlockSpec(shape, idx, pipeline_mode=pl.Buffered(1))
        return pl.BlockSpec(shape, idx)

    hb = lt // _LANE                                 # halo blocks per output tile
    max_hb = (xe.shape[-1] - 1) // _LANE             # last valid (possibly partial) halo block
    # For the final ragged tile the true halo column may lie past the end of xe; clamp the block
    # index -- its value then only feeds output columns that are dropped anyway.
    halo_idx = lambda n, t: (n, 0, jnp.minimum((t + 1) * hb, max_hb))

    return pl.pallas_call(
        _downsample1d_kernel,
        out_shape=jax.ShapeDtypeStruct((N, C, L_out), x.dtype),
        grid_spec=pltpu.PrefetchScalarGridSpec(
            num_scalar_prefetch=0,
            grid=(N, num_l_tiles),
            in_specs=[
                _resident((C, C)),                                             # W0 (resident)
                _resident((C, C)),                                             # W1 (resident)
                _resident((C, C)),                                             # W2 (resident)
                _resident((C, 1)),                                             # bias (resident)
                pl.BlockSpec((pl.Squeezed(), C, lt), lambda n, t: (n, 0, t)),  # xe tile
                pl.BlockSpec((pl.Squeezed(), C, _LANE), halo_idx),             # xe halo column
                pl.BlockSpec((pl.Squeezed(), C, lt), lambda n, t: (n, 0, t)),  # xo tile
            ],
            out_specs=pl.BlockSpec((pl.Squeezed(), C, lt), lambda n, t: (n, 0, t)),
        ),
        compiler_params=pltpu.CompilerParams(
            # Neither axis carries cross-step state (each output block written exactly once),
            # so both may be sharded across a v7x megacore.
            dimension_semantics=("parallel", "parallel"),
            vmem_limit_bytes=vmem_limit,
        ),
    )(w0, w1, w2, b_col, xe, xe, xo)


def downsample1d(x, weight, bias, *, block_l=None, use_pallas=None):
    """Conv1d(dim, dim, kernel_size=3, stride=2, padding=1) forward (PyTorch Downsample1d).

    x:      (N, C, L)
    weight: (C, C, 3)   (cout, cin, k) -- PyTorch Conv1d layout
    bias:   (C,)
    returns (N, C, L_out) with L_out = (L - 1) // 2 + 1
    """
    N, C, L = x.shape
    assert weight.shape == (C, C, 3) and bias.shape == (C,)
    L_out = (L - 1) // 2 + 1

    if use_pallas is None:
        # Tiny problems are dominated by launch/grid overhead; let XLA's conv handle them.
        use_pallas = C >= 128 and L_out >= 128
    if not use_pallas:
        return _reference_conv(x, weight, bias)
    return _downsample1d_pallas(x, weight, bias, block_l=block_l)


if __name__ == "__main__":
    key = jax.random.PRNGKey(0)
    k_x, k_w, k_b = jax.random.split(key, 3)

    # Small demo shapes consistent with the module: batch=2, dim (channels)=4, length=16.
    N, C, L = 2, 4, 16
    x = jax.random.normal(k_x, (N, C, L), dtype=jnp.float32)
    bound = 1.0 / ((C * 3) ** 0.5)
    weight = jax.random.uniform(k_w, (C, C, 3), minval=-bound, maxval=bound, dtype=jnp.float32)
    bias = jax.random.uniform(k_b, (C,), minval=-bound, maxval=bound, dtype=jnp.float32)

    y = downsample1d(x, weight, bias, use_pallas=True)   # force the Pallas path at demo size
    y = jax.block_until_ready(y)
    assert y.shape == (N, C, (L - 1) // 2 + 1)
    y_ref = _reference_conv(x, weight, bias)
    assert jnp.allclose(y, y_ref, atol=1e-5, rtol=1e-4), "mismatch vs reference conv (demo)"

    # Second check: several L tiles -- two full tiles that genuinely need the cross-tile halo
    # fix-up plus a ragged final tile (clamped halo index, partial-block loads/stores).
    k_x2, k_w2, k_b2 = jax.random.split(jax.random.PRNGKey(1), 3)
    N2, C2, L2 = 2, 8, 600          # L_out = 300 -> 128-wide tiles: full, full, ragged(44)
    x2 = jax.random.normal(k_x2, (N2, C2, L2), dtype=jnp.float32)
    bound2 = 1.0 / ((C2 * 3) ** 0.5)
    w_big = jax.random.uniform(k_w2, (C2, C2, 3), minval=-bound2, maxval=bound2, dtype=jnp.float32)
    b_big = jax.random.uniform(k_b2, (C2,), minval=-bound2, maxval=bound2, dtype=jnp.float32)
    y2 = jax.block_until_ready(downsample1d(x2, w_big, b_big, block_l=128, use_pallas=True))
    y2_ref = _reference_conv(x2, w_big, b_big)
    assert jnp.allclose(y2, y2_ref, atol=1e-5, rtol=1e-4), "mismatch vs reference conv (tiled)"

    print("KERNEL_OK")
</pallas_src>

<mosaic_0001>
module attributes {stable_mosaic.version = 11 : i64} {
  func.func @_downsample1d_kernel(%arg0: i32, %arg1: i32, %arg2: memref<4x4xf32, #tpu.memory_space<vmem>>, %arg3: memref<4x4xf32, #tpu.memory_space<vmem>>, %arg4: memref<4x4xf32, #tpu.memory_space<vmem>>, %arg5: memref<4x1xf32, #tpu.memory_space<vmem>>, %arg6: memref<1x4x128xf32, #tpu.memory_space<vmem>>, %arg7: memref<1x4x128xf32, #tpu.memory_space<vmem>>, %arg8: memref<1x4x128xf32, #tpu.memory_space<vmem>>, %arg9: memref<1x4x128xf32, #tpu.memory_space<vmem>>) attributes {dimension_semantics = [#tpu.dimension_semantics<parallel>, #tpu.dimension_semantics<parallel>], iteration_bounds = array<i64: 2, 1>, scalar_prefetch = 0 : i64, scratch_operands = 0 : i64, tpu.core_type = #tpu.core_type<tc>, window_params = [{pipeline_mode = #tpu.pipeline_mode<synchronous>, transform_indices = @transform_0, window_bounds = array<i64: 4, 4>}, {pipeline_mode = #tpu.pipeline_mode<synchronous>, transform_indices = @transform_1, window_bounds = array<i64: 4, 4>}, {pipeline_mode = #tpu.pipeline_mode<synchronous>, transform_indices = @transform_2, window_bounds = array<i64: 4, 4>}, {pipeline_mode = #tpu.pipeline_mode<synchronous>, transform_indices = @transform_3, window_bounds = array<i64: 4, 1>}, {transform_indices = @transform_4, window_bounds = array<i64: 1, 4, 128>}, {transform_indices = @transform_5, window_bounds = array<i64: 1, 4, 128>}, {transform_indices = @transform_6, window_bounds = array<i64: 1, 4, 128>}, {transform_indices = @transform_7, window_bounds = array<i64: 1, 4, 128>}]} {
    %c0 = arith.constant 0 : index
    %c0_0 = arith.constant 0 : index
    %c0_1 = arith.constant 0 : index
    %0 = vector.load %arg6[%c0, %c0_0, %c0_1] : memref<1x4x128xf32, #tpu.memory_space<vmem>>, vector<1x4x128xf32>
    %1 = vector.shape_cast %0 : vector<1x4x128xf32> to vector<4x128xf32>
    %c127_i32 = arith.constant 127 : i32
    %2 = tpu.dynamic_rotate %1 by %c127_i32 dim 1 : vector<4x128xf32>, i32 -> vector<4x128xf32>
    %c0_2 = arith.constant 0 : index
    %c0_3 = arith.constant 0 : index
    %3 = vector.load %arg2[%c0_2, %c0_3] : memref<4x4xf32, #tpu.memory_space<vmem>>, vector<4x4xf32>
    %cst = arith.constant dense<0.000000e+00> : vector<4x128xf32>
    %4 = tpu.matmul %3, %1, %cst {dimension_numbers = #tpu.dot_dimension_numbers<[1], [0], [0], [1], [0, 0, 1, 1], [], []>} : vector<4x4xf32>, vector<4x128xf32>, vector<4x128xf32> -> vector<4x128xf32>
    %c0_4 = arith.constant 0 : index
    %c0_5 = arith.constant 0 : index
    %5 = vector.load %arg3[%c0_4, %c0_5] : memref<4x4xf32, #tpu.memory_space<vmem>>, vector<4x4xf32>
    %c0_6 = arith.constant 0 : index
    %c0_7 = arith.constant 0 : index
    %c0_8 = arith.constant 0 : index
    %6 = vector.load %arg8[%c0_6, %c0_7, %c0_8] : memref<1x4x128xf32, #tpu.memory_space<vmem>>, vector<1x4x128xf32>
    %7 = vector.shape_cast %6 : vector<1x4x128xf32> to vector<4x128xf32>
    %cst_9 = arith.constant dense<0.000000e+00> : vector<4x128xf32>
    %8 = tpu.matmul %5, %7, %cst_9 {dimension_numbers = #tpu.dot_dimension_numbers<[1], [0], [0], [1], [0, 0, 1, 1], [], []>} : vector<4x4xf32>, vector<4x128xf32>, vector<4x128xf32> -> vector<4x128xf32>
    %9 = arith.addf %4, %8 : vector<4x128xf32>
    %c0_10 = arith.constant 0 : index
    %c0_11 = arith.constant 0 : index
    %10 = vector.load %arg4[%c0_10, %c0_11] : memref<4x4xf32, #tpu.memory_space<vmem>>, vector<4x4xf32>
    %cst_12 = arith.constant dense<0.000000e+00> : vector<4x128xf32>
    %11 = tpu.matmul %10, %2, %cst_12 {dimension_numbers = #tpu.dot_dimension_numbers<[1], [0], [0], [1], [0, 0, 1, 1], [], []>} : vector<4x4xf32>, vector<4x128xf32>, vector<4x128xf32> -> vector<4x128xf32>
    %12 = arith.addf %9, %11 : vector<4x128xf32>
    %c0_13 = arith.constant 0 : index
    %c0_14 = arith.constant 0 : index
    %13 = vector.load %arg5[%c0_13, %c0_14] : memref<4x1xf32, #tpu.memory_space<vmem>>, vector<4x1xf32>
    %14 = vector.broadcast %13 : vector<4x1xf32> to vector<4x128xf32>
    %15 = arith.addf %12, %14 : vector<4x128xf32>
    %c0_15 = arith.constant 0 : index
    %c0_16 = arith.constant 0 : index
    %c0_17 = arith.constant 0 : index
    %16 = vector.load %arg9[%c0_15, %c0_16, %c0_17] : memref<1x4x128xf32, #tpu.memory_space<vmem>>, vector<1x4x128xf32>
    %17 = vector.shape_cast %16 : vector<1x4x128xf32> to vector<4x128xf32>
    %18 = vector.shape_cast %15 : vector<4x128xf32> to vector<1x4x128xf32>
    tpu.vector_store %arg9[%c0_15, %c0_16, %c0_17], %18 {strides = array<i32>} : memref<1x4x128xf32, #tpu.memory_space<vmem>>, vector<1x4x128xf32>,
    %c0_18 = arith.constant 0 : index
    %c0_19 = arith.constant 0 : index
    %19 = vector.load %arg4[%c0_18, %c0_19] : memref<4x4xf32, #tpu.memory_space<vmem>>, vector<4x4xf32>
    %c0_20 = arith.constant 0 : index
    %c0_21 = arith.constant 0 : index
    %c0_22 = arith.constant 0 : index
    %20 = vector.load %arg7[%c0_20, %c0_21, %c0_22] : memref<1x4x128xf32, #tpu.memory_space<vmem>>, vector<1x4x1xf32>
    %21 = vector.shape_cast %20 : vector<1x4x1xf32> to vector<4x1xf32>
    %22 = vector.extract_strided_slice %1 {offsets = [0, 0], sizes = [4, 1], strides = [1, 1]} : vector<4x128xf32> to vector<4x1xf32>
    %23 = arith.subf %21, %22 : vector<4x1xf32>
    %cst_23 = arith.constant dense<0.000000e+00> : vector<4x1xf32>
    %24 = tpu.matmul %19, %23, %cst_23 {dimension_numbers = #tpu.dot_dimension_numbers<[1], [0], [0], [1], [0, 0, 1, 1], [], []>} : vector<4x4xf32>, vector<4x1xf32>, vector<4x1xf32> -> vector<4x1xf32>
    %c0_24 = arith.constant 0 : index
    %c0_25 = arith.constant 0 : index
    %c127 = arith.constant 127 : index
    %25 = vector.load %arg9[%c0_24, %c0_25, %c127] : memref<1x4x128xf32, #tpu.memory_space<vmem>>, vector<1x4x1xf32>
    %26 = vector.shape_cast %25 : vector<1x4x1xf32> to vector<4x1xf32>
    %27 = arith.addf %26, %24 : vector<4x1xf32>
    %c0_26 = arith.constant 0 : index
    %c0_27 = arith.constant 0 : index
    %c127_28 = arith.constant 127 : index
    %28 = vector.load %arg9[%c0_26, %c0_27, %c127_28] : memref<1x4x128xf32, #tpu.memory_space<vmem>>, vector<1x4x1xf32>
    %29 = vector.shape_cast %28 : vector<1x4x1xf32> to vector<4x1xf32>
    %30 = vector.shape_cast %27 : vector<4x1xf32> to vector<1x4x1xf32>
    tpu.vector_store %arg9[%c0_26, %c0_27, %c127_28], %30 {strides = array<i32>} : memref<1x4x128xf32, #tpu.memory_space<vmem>>, vector<1x4x1xf32>,
    return
  }
  func.func @transform_0(%arg0: i32, %arg1: i32) -> (i32, i32) {
    %c0_i32 = arith.constant 0 : i32
    %c0_i32_0 = arith.constant 0 : i32
    %c0_i32_1 = arith.constant 0 : i32
    return %c0_i32, %c0_i32_0 : i32, i32
  }
  func.func @transform_1(%arg0: i32, %arg1: i32) -> (i32, i32) {
    %c0_i32 = arith.constant 0 : i32
    %c0_i32_0 = arith.constant 0 : i32
    %c0_i32_1 = arith.constant 0 : i32
    return %c0_i32, %c0_i32_0 : i32, i32
  }
  func.func @transform_2(%arg0: i32, %arg1: i32) -> (i32, i32) {
    %c0_i32 = arith.constant 0 : i32
    %c0_i32_0 = arith.constant 0 : i32
    %c0_i32_1 = arith.constant 0 : i32
    return %c0_i32, %c0_i32_0 : i32, i32
  }
  func.func @transform_3(%arg0: i32, %arg1: i32) -> (i32, i32) {
    %c0_i32 = arith.constant 0 : i32
    %c0_i32_0 = arith.constant 0 : i32
    %c0_i32_1 = arith.constant 0 : i32
    return %c0_i32, %c0_i32_0 : i32, i32
  }
  func.func @transform_4(%arg0: i32, %arg1: i32) -> (i32, i32, i32) {
    %c0_i32 = arith.constant 0 : i32
    %c0_i32_0 = arith.constant 0 : i32
    return %arg0, %c0_i32, %arg1 : i32, i32, i32
  }
  func.func @transform_5(%arg0: i32, %arg1: i32) -> (i32, i32, i32) {
    %c1_i32 = arith.constant 1 : i32
    %0 = arith.addi %arg1, %c1_i32 : i32
    %c1_i32_0 = arith.constant 1 : i32
    %1 = arith.muli %0, %c1_i32_0 : i32
    %c0_i32 = arith.constant 0 : i32
    %2 = arith.minsi %1, %c0_i32 : i32
    %c0_i32_1 = arith.constant 0 : i32
    %c0_i32_2 = arith.constant 0 : i32
    return %arg0, %c0_i32_1, %2 : i32, i32, i32
  }
  func.func @transform_6(%arg0: i32, %arg1: i32) -> (i32, i32, i32) {
    %c0_i32 = arith.constant 0 : i32
    %c0_i32_0 = arith.constant 0 : i32
    return %arg0, %c0_i32, %arg1 : i32, i32, i32
  }
  func.func @transform_7(%arg0: i32, %arg1: i32) -> (i32, i32, i32) {
    %c0_i32 = arith.constant 0 : i32
    %c0_i32_0 = arith.constant 0 : i32
    return %arg0, %c0_i32, %arg1 : i32, i32, i32
  }
}

</mosaic_0001>

<bundles_post_ra>
// kernel: _downsample1d_pallas.1
= control target key start
LH: loop header
LB: loop body
LE: loop exit
PB: predicated region body
PF: predicated region fallthrough
CT: control target
= control target key end

     0   :  { %12 = vsyncpa [#allocation3], 0  ;;  %s1204_s0 = inlined_call_operand.vmem [shape: f32[4,4], index: 0, kind: input, shape index: {}]   ;;  %s1205_s1 = inlined_call_operand.vmem [shape: f32[4,4], index: 1, kind: input, shape index: {}]   ;;  %s1206_s2 = inlined_call_operand.vmem [shape: f32[4,4], index: 2, kind: input, shape index: {}]   ;;  %s1207_s3 = inlined_call_operand.vmem [shape: f32[4,1], index: 3, kind: input, shape index: {}]   ;;  %s1208_s4 = inlined_call_operand.vmem [shape: f32[2,4,9], index: 4, kind: input, shape index: {}, may-alias: {4,5}]   ;;  %s1209_s5 = inlined_call_operand.vmem [shape: f32[2,4,9], index: 5, kind: input, shape index: {}, may-alias: {4,5}]   ;;  %s1210_s6 = inlined_call_operand.vmem [shape: f32[2,4,8], index: 6, kind: input, shape index: {}]   ;;  %s1211_s7 = inlined_call_operand.hbm [shape: f32[2,4,8], index: 7, kind: output, shape index: {}]  }
   0x1   :  { %14 = vsyncpa [#allocation3 + $0x1], 0  ;;  %s1059_s24 = smov 0   ;;  %s1061_s25 = smov 0  }
   0x2   :  { %s1063_s26 = smov 0   ;;  %s1065_s27 = smov 0  }
   0x3   :  { %s1067_s28 = smov 0   ;;  %s1069_s29 = smov 0  }
   0x4 LB: > { %s825_s30 = sadd.s32 4294967295, %s1012_s29   ;;  %s826_s8 = sadd.s32 4294967294, %s1012_s29   ;;  %s1012_s29 = sphi %s1069_s29, %s20_s29   ;;  %s1008_s28 = sphi %s1067_s28, %s1221_s28   ;;  %s1004_s27 = sphi %s1065_s27, %s1220_s27   ;;  %s1000_s26 = sphi %s1063_s26, %s1219_s26   ;;  %s996_s25 = sphi %s1061_s25, %s1218_s25   ;;  %s992_s24 = sphi %s1059_s24, %s1217_s24  }
   0x5   : > { %s32_s9 = sadd.s32 1, %s1008_s28  ;;  %s215_s10 = sadd.s32 1, %s1000_s26 }
   0x6   : > { %p34_p0 = scmp.ge.s32.totalorder %s32_s9, 2  ;;  %p225_p1 = scmp.ne.s32.totalorder %s1000_s26, %s996_s25 }
   0x7   : > { %p226_p2 = scmp.eq.s32.totalorder %s825_s30, 1  ;;  %p231_p3 = scmp.ne.s32.totalorder %s996_s25, %s992_s24 }
   0x8   : > { %s1223_s9 = smov (%p34_p0, %s32_s9), 0  ;;  %p232_p5 = scmp.eq.s32.totalorder %s826_s8, 1 }
   0x9   : > { %1213 = sst [smem:[#allocation5_spill]] %s1223_s9  ;;  %p1099_p4 = por %p226_p2, %p225_p1 }
   0xa   : > { %s210_s12 = ssub.s32 %s1008_s28, %s1223_s9  ;;  %p829_p6 = scmp.ge.s32.totalorder %s1012_s29, 1 }
   0xb   : > { %p213_p7 = scmp.eq.s32.totalorder %s210_s12, 0  ;;  %p1106_p8 = por %p232_p5, %p231_p3 }
   0xc   : > { %p298_p9 = scmp.lt.s32.totalorder %s1012_s29, 3 }
   0xd   : > { %s1112_s14 = scalar_select %p213_p7, %s1000_s26, %s215_s10  }
   0xe   : > { %p299_p10 = pnand %p829_p6, %p298_p9 }
   0xf   : > { %p349_p11 = scmp.lt.s32.totalorder (!%p299_p10), %s1004_s27, 1  ;;  %v1014_v0 = vmov (!%p299_p10), 0.0   ;;  %vm1015_vm0 = vmmov (!%p299_p10), 0   ;;  %v1016_v1 = vmov (!%p299_p10), 0   ;;  %vm386_vm1 = vcmask (!%p299_p10), 1043456   ;;  %s1017_s17 = smov (!%p299_p10), 127  }
  0x10   : > { %302 = sbr.rel (%p299_p10) target bundleno = 384 (0x180), region = 48  ;;  %859 = vmatprep.subr.mxu1 (!%p299_p10), %v1014_v0  ;;  %861 = vmatprep.mubr.msk.f32.mxu1 (!%p299_p10), %vm1015_vm0, %v1014_v0  ;;  %v379_v2 = vld [vmem:[%s1204_s0] sm:$0xf] (!%p299_p10)  ;;  %vm382_vm2 = vcmask (!%p299_p10), 31744   ;;  %s843_s8 = sshll.u32 (!%p299_p10), %s1004_s27, 6  ;;  %vm707_vm3 = vcmask (!%p299_p10), 1044472  }
  0x11   : > { %854 = vmatprep.subr.mxu0 (!%p299_p10), %v1014_v0  ;;  %856 = vmatprep.mubr.msk.f32.mxu0 (!%p299_p10), %vm1015_vm0, %v1014_v0  ;;  %v380_v5 = vld [vmem:[%s1205_s1] sm:$0xf] (!%p299_p10) }
  0x12   : > { %933 = vset.pattern.permute.xlu0 (!%p299_p10), %v1016_v1  ;;  %v622_v8 = vld [vmem:[%s1206_s2] sm:$0xf] (!%p299_p10) }
  0x13   : > { %v614_v9 = vld [vmem:[%s1207_s3] sm:$0xf] (!%p299_p10) }
  0x14   : > { %v536_v10 = vld [vmem:[%s1206_s2] sm:$0xf] (!%p299_p10) }
  0x17   : > { %s350_s15 = scalar_select %p349_p11, %s1004_s27, 1 }
  0x18   : > { %s1018_s27 = smov [#allocation2]  }
  0x19   : > { %s831_s16 = sshll.u32 %s350_s15, 2 }
  0x1a   : > { %s355_s19 = scalar_lea.vmem %s1208_s4, %s831_s16  ;;  %s365_s22 = scalar_lea.vmem %s1209_s5, %s831_s16 }
  0x1b   : > { %v376_v3 = vld [vmem:[%s355_s19] sm:$0xf]  ;;  %s375_s12 = scalar_lea.vmem %s1210_s6, %s831_s16  ;;  %s938_s16 = sshll.u32 %s1018_s27, 4  ;;  %s939_s16 = int_to_ptr.vmem [resolvable:$false] %s938_s16 }
  0x1c   : > { %v623_v4 = vld [vmem:[%s365_s22] sm:$0xf]  ;;  %377 = vrot.lane.b32.xlu0 %v376_v3, %s1017_s17  ;;  %860 = vmatpush3.msk.msra.mxu1 %vm386_vm1, %v376_v3  ;;  %s346_s22 = sand.u32 1, %s996_s25   ;;  %s940_s9 = scalar_lea.vmem %s939_s16, 128 }
  0x1d   : > { %v624_v6 = vsub.f32 %v623_v4, %v376_v3  ;;  %v381_v7 = vld [vmem:[%s375_s12] sm:$0xf]  ;;  %862 = vmatmul.mubr.msk.f32.vlgmr.msra.gmra.mrb[0].mxu1 %vm382_vm2, %v379_v2  ;;  %869 = vmatprep.subr.mxu1 %v1014_v0  ;;  %s830_s23 = sshll.u32 %s346_s22, 2  ;;  %s710_s18 = scalar_lea.sflag [#allocation3], %s346_s22 }
  0x1e   : > { %855 = vmatpush3.msk.msra.mxu0 %vm386_vm1, %v381_v7  ;;  %871 = vmatprep.mubr.msk.f32.mxu1 %vm1015_vm0, %v1014_v0  ;;  %s348_s30 = scalar_lea.vmem [#allocation2], %s830_s23 }
  0x1f   : > { %857 = vmatmul.mubr.msk.f32.vlgmr.msra.gmra.mrb[0].mxu0 %vm382_vm2, %v380_v5  ;;  %870 = vmatpush3.msk.msra.mxu1 %vm386_vm1, %v624_v6  ;;  %s724_s10 = sshll.u32 %s348_s30, 4  ;;  %s1159_s10 = int_to_ptr.vmem [resolvable:$true] %s724_s10 }
  0x20   : > { %864 = vmatprep.subr.mxu0 %v1014_v0  ;;  %866 = vmatprep.mubr.msk.f32.mxu0 %vm1015_vm0, %v1014_v0  ;;  %s934_s19 = scalar_lea.vmem %s1159_s10, 64  ;;  %p941_p1 = scmp.lt.s32.totalorder %s1159_s10, %s939_s16 }
  0x21   : > { %872 = vmatmul.mubr.msk.f32.vlgmr.msra.gmra.mrb[2].mxu1 %vm382_vm2, %v622_v8  ;;  %617 = vperm.xlu0 %933, %v614_v9   ;;  %p935_p12 = scmp.ne.s32.totalorder %s1159_s10, %s934_s19  ;;  %p942_p2 = scmp.lt.s32.totalorder %s940_s9, %s934_s19 }
  0x23   : > { %p936_p13 = pnand %p935_p12, %p1099_p4  ;;  %p943_p3 = por %p942_p2, %p941_p1 }
  0x25   : > { %p937_p0 = pneg %p936_p13 }
  0x27   : > { %p944_p5 = pnand %p943_p3, %p937_p0 }
  0x8e   : > { %v378_v11 = vpop.permute.xlu0 %377 }
  0x8f   : > { %865 = vmatpush3.msk.msra.mxu0 %vm386_vm1, %v378_v11 }
  0x90   : > { %867 = vmatmul.mubr.msk.f32.vlgmr.msra.gmra.mrb[2].mxu0 %vm382_vm2, %v536_v10 }
  0xa0   : > { %v618_v20 = vpop.permute.xlu0 %617 }
  0xf0   : > { %v532_v12 = vpop.f32.mrb[0].mxu1 }
  0xf1   : > { %v863_v14 = vpop.f32.mrb[1].mxu1 }
  0xf2   : > { %v456_v13 = vpop.f32.mrb[0].mxu0 }
  0xf3   : > { %v533_v15 = vadd.f32 %v532_v12, %v456_v13  ;;  %v858_v16 = vpop.f32.mrb[1].mxu0 }
  0xf4   : > { %v697_v17 = vpop.f32.mrb[2].mxu1 }
  0xf5   : > { %703 = vrot.lane.b32.xlu1 %v697_v17, %s1017_s17  ;;  %v873_v18 = vpop.f32.mrb[3].mxu1  ;;  %s1157_s17 = scalar_lea.hbm %s1211_s7, %s843_s8 }
 0x163   : > { %v609_v19 = vpop.f32.mrb[2].mxu0 }
 0x164   : > { %v613_v21 = vadd.f32 %v609_v19, %v533_v15  ;;  %v868_v22 = vpop.f32.mrb[3].mxu0 }
 0x166   : > { %v620_v23 = vadd.f32 %v618_v20, %v613_v21 }
 0x167   : > { %v704_v24 = vpop.permute.xlu1 %703 }
 0x168   : > { %621 = vst [vmem:[%s348_s30] sm:$0xf] %v620_v23 }
 0x16f   : > { %v701_v25 = vld [vmem:[%s348_s30] sm:$0xf] }
 0x170   : > { %v706_v26 = vadd.f32 %v704_v24, %v701_v25 }
 0x172   : > { %708 = vst.msk [vmem:[%s348_s30] sm:$0xf] %vm707_vm3, %v706_v26 }
 0x173   : > { %947 = shalt.err (!%p944_p5)
}
 0x174   : > { %s948_s20 = scalar_lea.hbm %s1157_s17, 64  ;;  %s952_s23 = scalar_lea.hbm %s1211_s7, 128 }
 0x175   : > { %p949_p6 = scmp.ne.s32.totalorder %s1157_s17, %s948_s20  ;;  %p953_p10 = scmp.lt.u32.totalorder %s1157_s17, %s1211_s7 }
 0x176   : > { %p954_p11 = scmp.lt.u32.totalorder %s952_s23, %s948_s20  ;;  %p956_p13 = scmp.lt.u32.totalorder %s948_s20, %s1157_s17 }
 0x177   : > { %p950_p7 = pnand %p949_p6, %p1099_p4 }
 0x178   : > { %p955_p12 = por %p954_p11, %p953_p10 }
 0x179   : > { %p951_p9 = pneg %p950_p7 }
 0x17a   : > { %p957_p0 = por %p956_p13, %p955_p12 }
 0x17c   : > { %p958_p1 = pnand %p957_p0, %p951_p9 }
 0x17e   : > { %961 = shalt.err (!%p958_p1)
}
 0x17f   : > { %874 = dma.vmem_to_hbm [thread:$0]  (%p1099_p4), %s1159_s10, 64, %s1157_s17, %s710_s18  }
 0x180 PF: > { %p880_p2 = scmp.ge.s32.totalorder %s1012_s29, 2  ;;  %s736_s12 = sand.u32 1, %s992_s24  }
 0x181   : > { %s737_s15 = scalar_lea.sflag [#allocation3], %s736_s12 }
 0x182   : > { %p877_p3 = pnand %p880_p2, %p1106_p8 }
 0x184   : > { %987 = dma.done.wait (!%p877_p3), %s737_s15, 64  }
 0x185   : > { %989 = vsyncadd (!%p877_p3), %s737_s15, 4294967232  ;;  %s20_s29 = sadd.s32 1, %s1012_s29   ;;  %s1216_s11 = sld [smem:[#allocation5_spill]] }
 0x186   : > { %p17_p5 = scmp.ge.s32.totalorder %s20_s29, 4   ;;  %s1217_s24 = smov %s996_s25 }
 0x187   : > { %s1218_s25 = smov %s1000_s26  ;;  %s1219_s26 = smov %s1112_s14 }
 0x188   : > { %s1220_s27 = smov %s1008_s28  ;;  %19 = sbr.rel (!%p17_p5) target bundleno = 4 (0x4), region = 89 }
 0x18b   : > { %s1221_s28 = smov %s1216_s11 }
 0x18f   :  { %742 = vsyncpa [#allocation3], 1 }
 0x190   :  { %744 = vsyncpa [#allocation3 + $0x1], 1 }

</bundles_post_ra>
